<compile_context>
chip_gen: v6e
topology: v6e:2x2x1
jax: 0.10.0
libtpu: 0.0.40
codegen_flags: <defaults>
</compile_context>

<pallas_src>
import functools

import jax
import jax.numpy as jnp
from jax import lax
from jax.experimental import pallas as pl
from jax.experimental.pallas import tpu as pltpu

EPS = 1e-5
PAD = 128   # lane-tile-aligned halo; every shifted tap read stays in-bounds


def _bn_relu(v, gamma, beta, inv_m):
    """Training-mode BatchNorm (biased stats over the folded N*H*W lane axis)
    followed by ReLU.  v: (C, L); gamma/beta: (C, 1)."""
    mu = jnp.sum(v, axis=1, keepdims=True) * inv_m
    vc = v - mu
    var = jnp.sum(vc * vc, axis=1, keepdims=True) * inv_m
    return jnp.maximum(vc * lax.rsqrt(var + EPS) * gamma + beta, 0.0)


def hlayer_kernel(xp_ref, xf_ref, p_ref, o_ref, yext_ref, *, Cp, H, W):
    Cout, L = o_ref.shape
    Cf = xf_ref.shape[0]
    Cin = Cp + Cf
    HW = H * W
    inv_m = 1.0 / float(L)          # 1 / (N*H*W)

    # ---- packed param block: [ w1^T | w2 im2col | g1 be1 g2 be2 ] ----------
    w2_off = Cin
    bn_off = Cin + 9 * Cout
    g1 = p_ref[:, bn_off + 0:bn_off + 1]
    be1 = p_ref[:, bn_off + 1:bn_off + 2]
    g2 = p_ref[:, bn_off + 2:bn_off + 3]
    be2 = p_ref[:, bn_off + 3:bn_off + 4]

    # ---- 1x1 conv with the channel-concat fused: y = W1a @ x_prev + W1b @ x_f
    y = (jnp.dot(p_ref[:, 0:Cp], xp_ref[...], preferred_element_type=jnp.float32)
         + jnp.dot(p_ref[:, Cp:Cin], xf_ref[...], preferred_element_type=jnp.float32))

    # ---- BN1 + ReLU (conv bias b1 cancels under the mean subtraction) ------
    y = _bn_relu(y, g1, be1, inv_m)

    # ---- halo-extended copy of y so the 9 shifted tap reads are in-bounds --
    yext_ref[:, 0:PAD] = jnp.zeros((Cout, PAD), jnp.float32)
    yext_ref[:, PAD + L:PAD + 2 * PAD + L - PAD + PAD] = jnp.zeros((Cout, PAD), jnp.float32)
    yext_ref[:, PAD:PAD + L] = y

    # ---- border masks.  N shares the lane axis, so BOTH row and column
    # borders are masked: this also kills any cross-batch tap leakage. -------
    lane = lax.broadcasted_iota(jnp.int32, (Cout, L), 1)
    col = lane % W            # w coordinate
    rpos = lane % HW          # h*W + w within one image
    m_top = rpos >= W         # h >= 1      (tap at h-1 exists)
    m_bot = rpos < HW - W     # h <= H-2    (tap at h+1 exists)
    m_lft = col >= 1          # w >= 1      (tap at w-1 exists)
    m_rgt = col <= W - 2      # w <= W-2    (tap at w+1 exists)

    # ---- 3x3 conv: nine accumulating (Cout,Cout)@(Cout,L) matmuls, no im2col
    # patch materialization.  Conv bias b2 dropped (BN cancels it). ----------
    acc = jnp.zeros((Cout, L), jnp.float32)
    k = 0
    for dy in (-1, 0, 1):
        for dx in (-1, 0, 1):
            off = dy * W + dx
            tap = yext_ref[:, PAD + off:PAD + off + L]
            m = None
            if dy == -1:
                m = m_top
            elif dy == 1:
                m = m_bot
            if dx == -1:
                m = m_lft if m is None else jnp.logical_and(m, m_lft)
            elif dx == 1:
                m = m_rgt if m is None else jnp.logical_and(m, m_rgt)
            if m is not None:
                tap = jnp.where(m, tap, 0.0)
            w_tap = p_ref[:, w2_off + k * Cout:w2_off + (k + 1) * Cout]
            acc = acc + jnp.dot(w_tap, tap, preferred_element_type=jnp.float32)
            k += 1

    # ---- BN2 + ReLU, one lane-dense (Cout, L) store -------------------------
    o_ref[...] = _bn_relu(acc, g2, be2, inv_m)


@jax.jit
def hlayer_forward(prevg_nchw, f_nchw, params):
    N, Cp, H, W = prevg_nchw.shape
    Cf = f_nchw.shape[1]
    Cin = Cp + Cf
    Cout = params["w1"].shape[1]
    HW = H * W
    L = N * HW
    assert PAD > W + 1 and L % 128 == 0 and Cout % 8 == 0

    # NCHW -> (C, N*H*W): leading-axis transpose only; the contiguous HW
    # blocks move as units.  Channels = sublanes, N folded into lanes.
    xp = jnp.transpose(prevg_nchw.reshape(N, Cp, HW), (1, 0, 2)
                       ).reshape(Cp, L).astype(jnp.float32)
    xf = jnp.transpose(f_nchw.reshape(N, Cf, HW), (1, 0, 2)
                       ).reshape(Cf, L).astype(jnp.float32)

    # One packed (Cout, Cin + 9*Cout + 4) param block -> a single entry DMA.
    w1t = params["w1"].astype(jnp.float32).T                         # (Cout, Cin)
    w2m = jnp.transpose(params["w2"].astype(jnp.float32), (3, 0, 1, 2)
                        ).reshape(Cout, 9 * Cout)                    # (Cout, 9*Cout)
    bn = jnp.stack([params["g1"][0], params["be1"][0],
                    params["g2"][0], params["be2"][0]], axis=1
                   ).astype(jnp.float32)                             # (Cout, 4)
    pblk = jnp.concatenate([w1t, w2m, bn], axis=1)
    # conv biases b1/b2 not passed: training-mode BN mean subtraction cancels them.

    vmem = pl.BlockSpec(memory_space=pltpu.MemorySpace.VMEM)
    out = pl.pallas_call(
        functools.partial(hlayer_kernel, Cp=Cp, H=H, W=W),
        out_shape=jax.ShapeDtypeStruct((Cout, L), jnp.float32),
        in_specs=[vmem, vmem, vmem],
        out_specs=vmem,
        scratch_shapes=[pltpu.VMEM((Cout, L + 2 * PAD), jnp.float32)],  # halo copy
    )(xp, xf, pblk)

    # (Cout, N*HW) -> NCHW: leading-axis transpose back, then free reshape.
    return jnp.transpose(out.reshape(Cout, N, HW), (1, 0, 2)).reshape(N, Cout, H, W)


def hlayer_reference(prevg_nchw, f_nchw, params):
    """Pure-JAX reference (NHWC compute) for correctness checking."""
    prevg = jnp.transpose(prevg_nchw, (0, 2, 3, 1))
    f = jnp.transpose(f_nchw, (0, 2, 3, 1))
    x = jnp.concatenate([prevg, f], axis=-1).astype(jnp.float32)

    y = jnp.einsum("nhwc,cd->nhwd", x, params["w1"]) + params["b1"][0]
    mu = y.mean((0, 1, 2)); var = y.var((0, 1, 2))
    y = (y - mu) / jnp.sqrt(var + EPS) * params["g1"][0] + params["be1"][0]
    y = jnp.maximum(y, 0.0)

    y2 = lax.conv_general_dilated(
        y, params["w2"], window_strides=(1, 1), padding="SAME",
        dimension_numbers=("NHWC", "HWIO", "NHWC")) + params["b2"][0]
    mu2 = y2.mean((0, 1, 2)); var2 = y2.var((0, 1, 2))
    y2 = (y2 - mu2) / jnp.sqrt(var2 + EPS) * params["g2"][0] + params["be2"][0]
    y2 = jnp.maximum(y2, 0.0)
    return jnp.transpose(y2, (0, 3, 1, 2))


def make_params(key, in_channels, out_channels):
    ks = jax.random.split(key, 8)
    return {
        "w1": 0.1 * jax.random.normal(ks[0], (in_channels, out_channels), jnp.float32),
        "b1": 0.1 * jax.random.normal(ks[1], (1, out_channels), jnp.float32),
        "g1": 1.0 + 0.1 * jax.random.normal(ks[2], (1, out_channels), jnp.float32),
        "be1": 0.1 * jax.random.normal(ks[3], (1, out_channels), jnp.float32),
        "w2": 0.1 * jax.random.normal(ks[4], (3, 3, out_channels, out_channels), jnp.float32),
        "b2": 0.1 * jax.random.normal(ks[5], (1, out_channels), jnp.float32),
        "g2": 1.0 + 0.1 * jax.random.normal(ks[6], (1, out_channels), jnp.float32),
        "be2": 0.1 * jax.random.normal(ks[7], (1, out_channels), jnp.float32),
    }


if __name__ == "__main__":
    key = jax.random.PRNGKey(0)
    k_prev, k_f, k_p = jax.random.split(key, 3)

    N, C_prev, C_f, H, W = 2, 4, 4, 16, 16     # inputChannels = 8
    out_channels = 8                           # outputChannels = 8

    input_prev_g = jax.random.normal(k_prev, (N, C_prev, H, W), jnp.float32)
    input_f = jax.random.normal(k_f, (N, C_f, H, W), jnp.float32)
    params = make_params(k_p, C_prev + C_f, out_channels)

    out = hlayer_forward(input_prev_g, input_f, params)
    out = jax.block_until_ready(out)

    ref = hlayer_reference(input_prev_g, input_f, params)
    assert out.shape == (N, out_channels, H, W)
    assert jnp.allclose(out, ref, rtol=1e-4, atol=1e-4), "mismatch vs reference"

    print("KERNEL_OK")
</pallas_src>

<mosaic_0001>
module attributes {stable_mosaic.version = 11 : i64} {
  func.func @hlayer_kernel(%arg0: memref<4x512xf32, #tpu.memory_space<vmem>>, %arg1: memref<4x512xf32, #tpu.memory_space<vmem>>, %arg2: memref<8x84xf32, #tpu.memory_space<vmem>>, %arg3: memref<8x512xf32, #tpu.memory_space<vmem>>, %arg4: memref<8x768xf32, #tpu.memory_space<vmem>>) attributes {dimension_semantics = [], scalar_prefetch = 0 : i64, scratch_operands = 1 : i64, tpu.core_type = #tpu.core_type<tc>} {
    %c0 = arith.constant 0 : index
    %c80 = arith.constant 80 : index
    %0 = vector.load %arg2[%c0, %c80] : memref<8x84xf32, #tpu.memory_space<vmem>>, vector<8x1xf32>
    %c0_0 = arith.constant 0 : index
    %c81 = arith.constant 81 : index
    %1 = vector.load %arg2[%c0_0, %c81] : memref<8x84xf32, #tpu.memory_space<vmem>>, vector<8x1xf32>
    %c0_1 = arith.constant 0 : index
    %c82 = arith.constant 82 : index
    %2 = vector.load %arg2[%c0_1, %c82] : memref<8x84xf32, #tpu.memory_space<vmem>>, vector<8x1xf32>
    %c0_2 = arith.constant 0 : index
    %c83 = arith.constant 83 : index
    %3 = vector.load %arg2[%c0_2, %c83] : memref<8x84xf32, #tpu.memory_space<vmem>>, vector<8x1xf32>
    %c0_3 = arith.constant 0 : index
    %c0_4 = arith.constant 0 : index
    %4 = vector.load %arg2[%c0_3, %c0_4] : memref<8x84xf32, #tpu.memory_space<vmem>>, vector<8x4xf32>
    %c0_5 = arith.constant 0 : index
    %c0_6 = arith.constant 0 : index
    %5 = vector.load %arg0[%c0_5, %c0_6] : memref<4x512xf32, #tpu.memory_space<vmem>>, vector<4x512xf32>
    %cst = arith.constant dense<0.000000e+00> : vector<8x512xf32>
    %6 = tpu.matmul %4, %5, %cst {dimension_numbers = #tpu.dot_dimension_numbers<[1], [0], [0], [1], [0, 0, 1, 1], [], []>} : vector<8x4xf32>, vector<4x512xf32>, vector<8x512xf32> -> vector<8x512xf32>
    %c0_7 = arith.constant 0 : index
    %c4 = arith.constant 4 : index
    %7 = vector.load %arg2[%c0_7, %c4] : memref<8x84xf32, #tpu.memory_space<vmem>>, vector<8x4xf32>
    %c0_8 = arith.constant 0 : index
    %c0_9 = arith.constant 0 : index
    %8 = vector.load %arg1[%c0_8, %c0_9] : memref<4x512xf32, #tpu.memory_space<vmem>>, vector<4x512xf32>
    %cst_10 = arith.constant dense<0.000000e+00> : vector<8x512xf32>
    %9 = tpu.matmul %7, %8, %cst_10 {dimension_numbers = #tpu.dot_dimension_numbers<[1], [0], [0], [1], [0, 0, 1, 1], [], []>} : vector<8x4xf32>, vector<4x512xf32>, vector<8x512xf32> -> vector<8x512xf32>
    %10 = arith.addf %6, %9 : vector<8x512xf32>
    %cst_11 = arith.constant dense<0.000000e+00> : vector<8xf32>
    %11 = vector.multi_reduction <add>, %10, %cst_11 [1] : vector<8x512xf32> to vector<8xf32>
    %12 = vector.shape_cast %11 : vector<8xf32> to vector<8x1xf32>
    %cst_12 = arith.constant 0.001953125 : f32
    %13 = vector.broadcast %cst_12 : f32 to vector<8x1xf32>
    %14 = arith.mulf %12, %13 : vector<8x1xf32>
    %15 = vector.broadcast %14 : vector<8x1xf32> to vector<8x512xf32>
    %16 = arith.subf %10, %15 : vector<8x512xf32>
    %17 = arith.mulf %16, %16 : vector<8x512xf32>
    %cst_13 = arith.constant dense<0.000000e+00> : vector<8xf32>
    %18 = vector.multi_reduction <add>, %17, %cst_13 [1] : vector<8x512xf32> to vector<8xf32>
    %19 = vector.shape_cast %18 : vector<8xf32> to vector<8x1xf32>
    %cst_14 = arith.constant 0.001953125 : f32
    %20 = vector.broadcast %cst_14 : f32 to vector<8x1xf32>
    %21 = arith.mulf %19, %20 : vector<8x1xf32>
    %cst_15 = arith.constant 9.99999974E-6 : f32
    %22 = vector.broadcast %cst_15 : f32 to vector<8x1xf32>
    %23 = arith.addf %21, %22 : vector<8x1xf32>
    %24 = math.rsqrt %23 : vector<8x1xf32>
    %25 = vector.broadcast %24 : vector<8x1xf32> to vector<8x512xf32>
    %26 = arith.mulf %16, %25 : vector<8x512xf32>
    %27 = vector.broadcast %0 : vector<8x1xf32> to vector<8x512xf32>
    %28 = arith.mulf %26, %27 : vector<8x512xf32>
    %29 = vector.broadcast %1 : vector<8x1xf32> to vector<8x512xf32>
    %30 = arith.addf %28, %29 : vector<8x512xf32>
    %cst_16 = arith.constant 0.000000e+00 : f32
    %31 = vector.broadcast %cst_16 : f32 to vector<8x512xf32>
    %32 = arith.maximumf %30, %31 : vector<8x512xf32>
    %cst_17 = arith.constant 0.000000e+00 : f32
    %33 = vector.broadcast %cst_17 : f32 to vector<8x128xf32>
    %c0_18 = arith.constant 0 : index
    %c0_19 = arith.constant 0 : index
    %34 = vector.load %arg4[%c0_18, %c0_19] : memref<8x768xf32, #tpu.memory_space<vmem>>, vector<8x128xf32>
    tpu.vector_store %arg4[%c0_18, %c0_19], %33 {strides = array<i32>} : memref<8x768xf32, #tpu.memory_space<vmem>>, vector<8x128xf32>,
    %cst_20 = arith.constant 0.000000e+00 : f32
    %35 = vector.broadcast %cst_20 : f32 to vector<8x128xf32>
    %c0_21 = arith.constant 0 : index
    %c640 = arith.constant 640 : index
    %36 = vector.load %arg4[%c0_21, %c640] : memref<8x768xf32, #tpu.memory_space<vmem>>, vector<8x128xf32>
    tpu.vector_store %arg4[%c0_21, %c640], %35 {strides = array<i32>} : memref<8x768xf32, #tpu.memory_space<vmem>>, vector<8x128xf32>,
    %c0_22 = arith.constant 0 : index
    %c128 = arith.constant 128 : index
    %37 = vector.load %arg4[%c0_22, %c128] : memref<8x768xf32, #tpu.memory_space<vmem>>, vector<8x512xf32>
    tpu.vector_store %arg4[%c0_22, %c128], %32 {strides = array<i32>} : memref<8x768xf32, #tpu.memory_space<vmem>>, vector<8x512xf32>,
    %38 = tpu.iota {dimensions = array<i32: 1>} : vector<8x512xi32>
    %c16_i32 = arith.constant 16 : i32
    %c0_i32 = arith.constant 0 : i32
    %39 = arith.cmpi eq, %c16_i32, %c0_i32 : i32
    %c1_i32 = arith.constant 1 : i32
    %40 = arith.select %39, %c1_i32, %c16_i32 : i32
    %41 = vector.broadcast %40 : i32 to vector<8x512xi32>
    %42 = arith.remsi %38, %41 : vector<8x512xi32>
    %c0_i32_23 = arith.constant 0 : i32
    %43 = vector.broadcast %c0_i32_23 : i32 to vector<8x512xi32>
    %44 = arith.cmpi ne, %42, %43 : vector<8x512xi32>
    %c0_i32_24 = arith.constant 0 : i32
    %45 = vector.broadcast %c0_i32_24 : i32 to vector<8x512xi32>
    %46 = arith.cmpi slt, %42, %45 : vector<8x512xi32>
    %c0_i32_25 = arith.constant 0 : i32
    %47 = arith.cmpi slt, %40, %c0_i32_25 : i32
    %48 = vector.broadcast %47 : i1 to vector<8x512xi1>
    %49 = vector.broadcast %48 : vector<8x512xi1> to vector<8x512xi1>
    %50 = arith.xori %46, %49 : vector<8x512xi1>
    %51 = arith.andi %50, %44 : vector<8x512xi1>
    %52 = vector.broadcast %40 : i32 to vector<8x512xi32>
    %53 = arith.addi %42, %52 : vector<8x512xi32>
    %54 = arith.select %51, %53, %42 : vector<8x512xi1>, vector<8x512xi32>
    %c256_i32 = arith.constant 256 : i32
    %c0_i32_26 = arith.constant 0 : i32
    %55 = arith.cmpi eq, %c256_i32, %c0_i32_26 : i32
    %c1_i32_27 = arith.constant 1 : i32
    %56 = arith.select %55, %c1_i32_27, %c256_i32 : i32
    %57 = vector.broadcast %56 : i32 to vector<8x512xi32>
    %58 = arith.remsi %38, %57 : vector<8x512xi32>
    %c0_i32_28 = arith.constant 0 : i32
    %59 = vector.broadcast %c0_i32_28 : i32 to vector<8x512xi32>
    %60 = arith.cmpi ne, %58, %59 : vector<8x512xi32>
    %c0_i32_29 = arith.constant 0 : i32
    %61 = vector.broadcast %c0_i32_29 : i32 to vector<8x512xi32>
    %62 = arith.cmpi slt, %58, %61 : vector<8x512xi32>
    %c0_i32_30 = arith.constant 0 : i32
    %63 = arith.cmpi slt, %56, %c0_i32_30 : i32
    %64 = vector.broadcast %63 : i1 to vector<8x512xi1>
    %65 = vector.broadcast %64 : vector<8x512xi1> to vector<8x512xi1>
    %66 = arith.xori %62, %65 : vector<8x512xi1>
    %67 = arith.andi %66, %60 : vector<8x512xi1>
    %68 = vector.broadcast %56 : i32 to vector<8x512xi32>
    %69 = arith.addi %58, %68 : vector<8x512xi32>
    %70 = arith.select %67, %69, %58 : vector<8x512xi1>, vector<8x512xi32>
    %c16_i32_31 = arith.constant 16 : i32
    %71 = vector.broadcast %c16_i32_31 : i32 to vector<8x512xi32>
    %72 = arith.cmpi sge, %70, %71 : vector<8x512xi32>
    %c240_i32 = arith.constant 240 : i32
    %73 = vector.broadcast %c240_i32 : i32 to vector<8x512xi32>
    %74 = arith.cmpi slt, %70, %73 : vector<8x512xi32>
    %c1_i32_32 = arith.constant 1 : i32
    %75 = vector.broadcast %c1_i32_32 : i32 to vector<8x512xi32>
    %76 = arith.cmpi sge, %54, %75 : vector<8x512xi32>
    %c14_i32 = arith.constant 14 : i32
    %77 = vector.broadcast %c14_i32 : i32 to vector<8x512xi32>
    %78 = arith.cmpi sle, %54, %77 : vector<8x512xi32>
    %cst_33 = arith.constant 0.000000e+00 : f32
    %79 = vector.broadcast %cst_33 : f32 to vector<8x512xf32>
    %c0_34 = arith.constant 0 : index
    %c111 = arith.constant 111 : index
    %80 = vector.load %arg4[%c0_34, %c111] : memref<8x768xf32, #tpu.memory_space<vmem>>, vector<8x512xf32>
    %81 = arith.andi %72, %76 : vector<8x512xi1>
    %cst_35 = arith.constant 0.000000e+00 : f32
    %82 = vector.broadcast %cst_35 : f32 to vector<8x512xf32>
    %83 = arith.select %81, %80, %82 : vector<8x512xi1>, vector<8x512xf32>
    %c0_36 = arith.constant 0 : index
    %c8 = arith.constant 8 : index
    %84 = vector.load %arg2[%c0_36, %c8] : memref<8x84xf32, #tpu.memory_space<vmem>>, vector<8x8xf32>
    %cst_37 = arith.constant dense<0.000000e+00> : vector<8x512xf32>
    %85 = tpu.matmul %84, %83, %cst_37 {dimension_numbers = #tpu.dot_dimension_numbers<[1], [0], [0], [1], [0, 0, 1, 1], [], []>} : vector<8x8xf32>, vector<8x512xf32>, vector<8x512xf32> -> vector<8x512xf32>
    %86 = arith.addf %79, %85 : vector<8x512xf32>
    %c0_38 = arith.constant 0 : index
    %c112 = arith.constant 112 : index
    %87 = vector.load %arg4[%c0_38, %c112] : memref<8x768xf32, #tpu.memory_space<vmem>>, vector<8x512xf32>
    %cst_39 = arith.constant 0.000000e+00 : f32
    %88 = vector.broadcast %cst_39 : f32 to vector<8x512xf32>
    %89 = arith.select %72, %87, %88 : vector<8x512xi1>, vector<8x512xf32>
    %c0_40 = arith.constant 0 : index
    %c16 = arith.constant 16 : index
    %90 = vector.load %arg2[%c0_40, %c16] : memref<8x84xf32, #tpu.memory_space<vmem>>, vector<8x8xf32>
    %cst_41 = arith.constant dense<0.000000e+00> : vector<8x512xf32>
    %91 = tpu.matmul %90, %89, %cst_41 {dimension_numbers = #tpu.dot_dimension_numbers<[1], [0], [0], [1], [0, 0, 1, 1], [], []>} : vector<8x8xf32>, vector<8x512xf32>, vector<8x512xf32> -> vector<8x512xf32>
    %92 = arith.addf %86, %91 : vector<8x512xf32>
    %c0_42 = arith.constant 0 : index
    %c113 = arith.constant 113 : index
    %93 = vector.load %arg4[%c0_42, %c113] : memref<8x768xf32, #tpu.memory_space<vmem>>, vector<8x512xf32>
    %94 = arith.andi %72, %78 : vector<8x512xi1>
    %cst_43 = arith.constant 0.000000e+00 : f32
    %95 = vector.broadcast %cst_43 : f32 to vector<8x512xf32>
    %96 = arith.select %94, %93, %95 : vector<8x512xi1>, vector<8x512xf32>
    %c0_44 = arith.constant 0 : index
    %c24 = arith.constant 24 : index
    %97 = vector.load %arg2[%c0_44, %c24] : memref<8x84xf32, #tpu.memory_space<vmem>>, vector<8x8xf32>
    %cst_45 = arith.constant dense<0.000000e+00> : vector<8x512xf32>
    %98 = tpu.matmul %97, %96, %cst_45 {dimension_numbers = #tpu.dot_dimension_numbers<[1], [0], [0], [1], [0, 0, 1, 1], [], []>} : vector<8x8xf32>, vector<8x512xf32>, vector<8x512xf32> -> vector<8x512xf32>
    %99 = arith.addf %92, %98 : vector<8x512xf32>
    %c0_46 = arith.constant 0 : index
    %c127 = arith.constant 127 : index
    %100 = vector.load %arg4[%c0_46, %c127] : memref<8x768xf32, #tpu.memory_space<vmem>>, vector<8x512xf32>
    %cst_47 = arith.constant 0.000000e+00 : f32
    %101 = vector.broadcast %cst_47 : f32 to vector<8x512xf32>
    %102 = arith.select %76, %100, %101 : vector<8x512xi1>, vector<8x512xf32>
    %c0_48 = arith.constant 0 : index
    %c32 = arith.constant 32 : index
    %103 = vector.load %arg2[%c0_48, %c32] : memref<8x84xf32, #tpu.memory_space<vmem>>, vector<8x8xf32>
    %cst_49 = arith.constant dense<0.000000e+00> : vector<8x512xf32>
    %104 = tpu.matmul %103, %102, %cst_49 {dimension_numbers = #tpu.dot_dimension_numbers<[1], [0], [0], [1], [0, 0, 1, 1], [], []>} : vector<8x8xf32>, vector<8x512xf32>, vector<8x512xf32> -> vector<8x512xf32>
    %105 = arith.addf %99, %104 : vector<8x512xf32>
    %c0_50 = arith.constant 0 : index
    %c128_51 = arith.constant 128 : index
    %106 = vector.load %arg4[%c0_50, %c128_51] : memref<8x768xf32, #tpu.memory_space<vmem>>, vector<8x512xf32>
    %c0_52 = arith.constant 0 : index
    %c40 = arith.constant 40 : index
    %107 = vector.load %arg2[%c0_52, %c40] : memref<8x84xf32, #tpu.memory_space<vmem>>, vector<8x8xf32>
    %cst_53 = arith.constant dense<0.000000e+00> : vector<8x512xf32>
    %108 = tpu.matmul %107, %106, %cst_53 {dimension_numbers = #tpu.dot_dimension_numbers<[1], [0], [0], [1], [0, 0, 1, 1], [], []>} : vector<8x8xf32>, vector<8x512xf32>, vector<8x512xf32> -> vector<8x512xf32>
    %109 = arith.addf %105, %108 : vector<8x512xf32>
    %c0_54 = arith.constant 0 : index
    %c129 = arith.constant 129 : index
    %110 = vector.load %arg4[%c0_54, %c129] : memref<8x768xf32, #tpu.memory_space<vmem>>, vector<8x512xf32>
    %cst_55 = arith.constant 0.000000e+00 : f32
    %111 = vector.broadcast %cst_55 : f32 to vector<8x512xf32>
    %112 = arith.select %78, %110, %111 : vector<8x512xi1>, vector<8x512xf32>
    %c0_56 = arith.constant 0 : index
    %c48 = arith.constant 48 : index
    %113 = vector.load %arg2[%c0_56, %c48] : memref<8x84xf32, #tpu.memory_space<vmem>>, vector<8x8xf32>
    %cst_57 = arith.constant dense<0.000000e+00> : vector<8x512xf32>
    %114 = tpu.matmul %113, %112, %cst_57 {dimension_numbers = #tpu.dot_dimension_numbers<[1], [0], [0], [1], [0, 0, 1, 1], [], []>} : vector<8x8xf32>, vector<8x512xf32>, vector<8x512xf32> -> vector<8x512xf32>
    %115 = arith.addf %109, %114 : vector<8x512xf32>
    %c0_58 = arith.constant 0 : index
    %c143 = arith.constant 143 : index
    %116 = vector.load %arg4[%c0_58, %c143] : memref<8x768xf32, #tpu.memory_space<vmem>>, vector<8x512xf32>
    %117 = arith.andi %74, %76 : vector<8x512xi1>
    %cst_59 = arith.constant 0.000000e+00 : f32
    %118 = vector.broadcast %cst_59 : f32 to vector<8x512xf32>
    %119 = arith.select %117, %116, %118 : vector<8x512xi1>, vector<8x512xf32>
    %c0_60 = arith.constant 0 : index
    %c56 = arith.constant 56 : index
    %120 = vector.load %arg2[%c0_60, %c56] : memref<8x84xf32, #tpu.memory_space<vmem>>, vector<8x8xf32>
    %cst_61 = arith.constant dense<0.000000e+00> : vector<8x512xf32>
    %121 = tpu.matmul %120, %119, %cst_61 {dimension_numbers = #tpu.dot_dimension_numbers<[1], [0], [0], [1], [0, 0, 1, 1], [], []>} : vector<8x8xf32>, vector<8x512xf32>, vector<8x512xf32> -> vector<8x512xf32>
    %122 = arith.addf %115, %121 : vector<8x512xf32>
    %c0_62 = arith.constant 0 : index
    %c144 = arith.constant 144 : index
    %123 = vector.load %arg4[%c0_62, %c144] : memref<8x768xf32, #tpu.memory_space<vmem>>, vector<8x512xf32>
    %cst_63 = arith.constant 0.000000e+00 : f32
    %124 = vector.broadcast %cst_63 : f32 to vector<8x512xf32>
    %125 = arith.select %74, %123, %124 : vector<8x512xi1>, vector<8x512xf32>
    %c0_64 = arith.constant 0 : index
    %c64 = arith.constant 64 : index
    %126 = vector.load %arg2[%c0_64, %c64] : memref<8x84xf32, #tpu.memory_space<vmem>>, vector<8x8xf32>
    %cst_65 = arith.constant dense<0.000000e+00> : vector<8x512xf32>
    %127 = tpu.matmul %126, %125, %cst_65 {dimension_numbers = #tpu.dot_dimension_numbers<[1], [0], [0], [1], [0, 0, 1, 1], [], []>} : vector<8x8xf32>, vector<8x512xf32>, vector<8x512xf32> -> vector<8x512xf32>
    %128 = arith.addf %122, %127 : vector<8x512xf32>
    %c0_66 = arith.constant 0 : index
    %c145 = arith.constant 145 : index
    %129 = vector.load %arg4[%c0_66, %c145] : memref<8x768xf32, #tpu.memory_space<vmem>>, vector<8x512xf32>
    %130 = arith.andi %74, %78 : vector<8x512xi1>
    %cst_67 = arith.constant 0.000000e+00 : f32
    %131 = vector.broadcast %cst_67 : f32 to vector<8x512xf32>
    %132 = arith.select %130, %129, %131 : vector<8x512xi1>, vector<8x512xf32>
    %c0_68 = arith.constant 0 : index
    %c72 = arith.constant 72 : index
    %133 = vector.load %arg2[%c0_68, %c72] : memref<8x84xf32, #tpu.memory_space<vmem>>, vector<8x8xf32>
    %cst_69 = arith.constant dense<0.000000e+00> : vector<8x512xf32>
    %134 = tpu.matmul %133, %132, %cst_69 {dimension_numbers = #tpu.dot_dimension_numbers<[1], [0], [0], [1], [0, 0, 1, 1], [], []>} : vector<8x8xf32>, vector<8x512xf32>, vector<8x512xf32> -> vector<8x512xf32>
    %135 = arith.addf %128, %134 : vector<8x512xf32>
    %cst_70 = arith.constant dense<0.000000e+00> : vector<8xf32>
    %136 = vector.multi_reduction <add>, %135, %cst_70 [1] : vector<8x512xf32> to vector<8xf32>
    %137 = vector.shape_cast %136 : vector<8xf32> to vector<8x1xf32>
    %cst_71 = arith.constant 0.001953125 : f32
    %138 = vector.broadcast %cst_71 : f32 to vector<8x1xf32>
    %139 = arith.mulf %137, %138 : vector<8x1xf32>
    %140 = vector.broadcast %139 : vector<8x1xf32> to vector<8x512xf32>
    %141 = arith.subf %135, %140 : vector<8x512xf32>
    %142 = arith.mulf %141, %141 : vector<8x512xf32>
    %cst_72 = arith.constant dense<0.000000e+00> : vector<8xf32>
    %143 = vector.multi_reduction <add>, %142, %cst_72 [1] : vector<8x512xf32> to vector<8xf32>
    %144 = vector.shape_cast %143 : vector<8xf32> to vector<8x1xf32>
    %cst_73 = arith.constant 0.001953125 : f32
    %145 = vector.broadcast %cst_73 : f32 to vector<8x1xf32>
    %146 = arith.mulf %144, %145 : vector<8x1xf32>
    %cst_74 = arith.constant 9.99999974E-6 : f32
    %147 = vector.broadcast %cst_74 : f32 to vector<8x1xf32>
    %148 = arith.addf %146, %147 : vector<8x1xf32>
    %149 = math.rsqrt %148 : vector<8x1xf32>
    %150 = vector.broadcast %149 : vector<8x1xf32> to vector<8x512xf32>
    %151 = arith.mulf %141, %150 : vector<8x512xf32>
    %152 = vector.broadcast %2 : vector<8x1xf32> to vector<8x512xf32>
    %153 = arith.mulf %151, %152 : vector<8x512xf32>
    %154 = vector.broadcast %3 : vector<8x1xf32> to vector<8x512xf32>
    %155 = arith.addf %153, %154 : vector<8x512xf32>
    %cst_75 = arith.constant 0.000000e+00 : f32
    %156 = vector.broadcast %cst_75 : f32 to vector<8x512xf32>
    %157 = arith.maximumf %155, %156 : vector<8x512xf32>
    %c0_76 = arith.constant 0 : index
    %c0_77 = arith.constant 0 : index
    %158 = vector.load %arg3[%c0_76, %c0_77] : memref<8x512xf32, #tpu.memory_space<vmem>>, vector<8x512xf32>
    tpu.vector_store %arg3[%c0_76, %c0_77], %157 {strides = array<i32>} : memref<8x512xf32, #tpu.memory_space<vmem>>, vector<8x512xf32>,
    return
  }
}

</mosaic_0001>

<bundles_post_ra>
// kernel: hlayer_forward.1
= control target key start
LH: loop header
LB: loop body
LE: loop exit
PB: predicated region body
PF: predicated region fallthrough
CT: control target
= control target key end

     0   :  { %vm29_vm0 = vcmask 1043456   ;;  %v2217_v3 = vmov 0.0   ;;  %s2218_s18 = smov 124   ;;  %vm26_vm1 = vcmask 31744   ;;  %v2219_v11 = vmov 80   ;;  %s2223_s22 = smov 15   ;;  %s2668_s2 = inlined_call_operand.vmem [shape: f32[8,84], index: 2, kind: input, shape index: {}]   ;;  %s2669_s1 = inlined_call_operand.vmem [shape: f32[4,512], index: 1, kind: input, shape index: {}]   ;;  %s2670_s0 = inlined_call_operand.vmem [shape: f32[4,512], index: 0, kind: input, shape index: {}]   ;;  %s2671_s3 = inlined_call_operand.vmem [shape: f32[8,512], index: 3, kind: output, shape index: {}]  }
   0x1   :  { %v2262_v0 = vld [vmem:[%s2668_s2] sm:$0xff]  ;;  %v18_v2 = vld [vmem:[%s2669_s1 + $0x8] sm:$0xff]  ;;  %102 = vmatprep.mubr.f32.mxu0 %v2217_v3  ;;  %173 = vmatprep.mubr.f32.mxu1 %v2217_v3  ;;  %v2220_v12 = vmov 81   ;;  %s2224_s23 = smov 112   ;;  %s2225_s24 = smov 1   ;;  %vm553_vm2 = vcmask 130048  }
   0x2   :  { %v17_v1 = vld [vmem:[%s2669_s1] sm:$0xff]  ;;  %20 = vrot.lane.b32.xlu0 %v2262_v0, %s2218_s18  ;;  %v25_v5 = vcombine.high %v18_v2, %v18_v2  ;;  %v16_v7 = vld [vmem:[%s2670_s0 + $0x8] sm:$0xff]  ;;  %2204 = vset.pattern.permute.xlu1 %v2219_v11  ;;  %s2222_s1 = smov 17   ;;  %s2226_s25 = smov 120   ;;  %vm569_vm4 = vcmask 64512   ;;  %vm529_vm6 = vcmask 138240  }
   0x3   :  { %v24_v4 = vcombine.high %v17_v1, %v17_v1  ;;  %v15_v6 = vld [vmem:[%s2670_s0] sm:$0xff]  ;;  %v183_v9 = vcombine.high %v16_v7, %v16_v7  ;;  %363 = vperm.xlu1 %2204, %v2262_v0   ;;  %s2221_s0 = smov 16   ;;  %s2227_s26 = smov 88   ;;  %vm874_vm14 = vcmask 121856  }
   0x4   :  { %v182_v8 = vcombine.high %v15_v6, %v15_v6  ;;  %2127 = vmatprep.subr.msk.mxu1 %vm29_vm0, %v25_v5  ;;  %s2228_s27 = smov 104   ;;  %s2229_s28 = smov 80  }
   0x5   :  { %2124 = vmatprep.subr.msk.mxu0 %vm29_vm0, %v24_v4  ;;  %2128 = vmatpush1.msk.msra.mxu1 %vm29_vm0, %v18_v2  ;;  %s2230_s29 = smov 96   ;;  %s2231_s30 = smov 127  }
   0x6   :  { %2125 = vmatpush1.msk.msra.mxu0 %vm29_vm0, %v17_v1  ;;  %2133 = vmatprep.subr.msk.mxu1 %vm29_vm0, %v183_v9  ;;  %s2232_s4 = smov 72   ;;  %s2233_s5 = smov 113  }
   0x7   :  { %2130 = vmatprep.subr.msk.mxu0 %vm29_vm0, %v182_v8  ;;  %2205 = vset.pattern.permute.xlu1 %v2220_v12  ;;  %s2234_s6 = smov 64   ;;  %s2235_s7 = smov 56  }
   0x8   :  { %371 = vperm.xlu1 %2205, %v2262_v0   ;;  %s2236_s8 = smov 111  }
   0xc   :  { %543 = vrot.lane.b32.xlu1 %v2217_v3, %s2221_s0 }
  0x10   :  { %519 = vrot.lane.b32.xlu1 %v2217_v3, %s2222_s1 }
  0x14   :  { %864 = vrot.lane.b32.xlu1 %v2217_v3, %s2223_s22 }
  0x74   :  { %v21_v10 = vpop.permute.xlu0 %20 }
  0x75   :  { %2126 = vmatmul.mubr.msk.f32.vlgmr.msra.gmra.mxu0 %vm26_vm1, %v21_v10  ;;  %2129 = vmatmul.mubr.msk.f32.vlgmr.msra.gmra.mxu1 %vm26_vm1, %v21_v10 }
  0x76   :  { %2131 = vmatpush1.msk.msra.mxu0 %vm29_vm0, %v15_v6  ;;  %258 = vmatprep.mubr.f32.mxu0 %v2217_v3 }
  0x77   :  { %2134 = vmatpush1.msk.msra.mxu1 %vm29_vm0, %v16_v7  ;;  %329 = vmatprep.mubr.f32.mxu1 %v2217_v3 }
  0x79   :  { %2132 = vmatmul.mubr.msk.f32.vlgmr.msra.gmra.mxu0 %vm26_vm1, %v2262_v0  ;;  %2135 = vmatmul.mubr.msk.f32.vlgmr.msra.gmra.mxu1 %vm26_vm1, %v2262_v0 }
  0x7a   :  { %636 = vmatprep.mubr.f32.mxu0 %v2217_v3  ;;  %707 = vmatprep.mubr.f32.mxu1 %v2217_v3 }
  0x7e   :  { %v364_v41 = vpop.permute.xlu1 %363 }
  0x83   :  { %v372_v42 = vpop.permute.xlu1 %371 }
  0x87   :  { %v2319_v43 = vpop.permute.xlu1 %543 }
  0x8b   :  { %v2321_v44 = vpop.permute.xlu1 %519 }
  0x8f   :  { %v2323_v45 = vpop.permute.xlu1 %864 }
 0x135   :  { %v104_v13 = vpop.f32.mrf.mxu0  ;;  %v175_v14 = vpop.f32.mrf.mxu1 }
 0x137   :  { %v106_v15 = vpop.f32.mrf.mxu0  ;;  %v177_v16 = vpop.f32.mrf.mxu1 }
 0x139   :  { %v260_v17 = vpop.f32.mrf.mxu0  ;;  %v331_v18 = vpop.f32.mrf.mxu1 }
 0x13a   :  { %v261_v20 = vadd.f32 %v260_v17, %v104_v13  ;;  %v332_v23 = vadd.f32 %v331_v18, %v175_v14 }
 0x13b   :  { %v262_v19 = vpop.f32.mrf.mxu0  ;;  %v333_v22 = vpop.f32.mrf.mxu1 }
 0x13c   :  { %v263_v21 = vadd.f32 %v262_v19, %v106_v15  ;;  %v334_v25 = vadd.f32 %v333_v22, %v177_v16  ;;  %v388_v15 = vlaneseq }
 0x13e   :  { %v336_v24 = vadd.f32 %v263_v21, %v261_v20  ;;  %v389_v18 = vand.u32 127, %v388_v15 }
 0x140   :  { %v337_v26 = vadd.f32 %v336_v24, %v332_v23  ;;  %v2418_v22 = vadd.s32 128, %v389_v18 }
 0x142   :  { %v338_v27 = vadd.f32 %v337_v26, %v334_v25 }
 0x144   :  { %339 = vadd.xlane.f32.xlu0 %v338_v27  ;;  %v397_v27 = vand.u32 15, %v389_v18 }
 0x146   :  { %vm2433_vm5 = vcmp.ge.s32.totalorder %v397_v27, 1  ;;  %vm2487_vm13 = vcmp.le.s32.totalorder %v397_v27, 14 }
 0x15a   :  { %567 = vrot.lane.b32.xlu0 %v2262_v0, %s2224_s23 }
 0x15e   :  { %714 = vrot.lane.b32.xlu0 %v2262_v0, %s2226_s25 }
 0x162   :  { %887 = vrot.lane.b32.xlu0 %v2262_v0, %s2228_s27 }
 0x166   :  { %1060 = vrot.lane.b32.xlu0 %v2262_v0, %s2230_s29 }
 0x1cd   :  { %v340_v28 = vpop.xlane.xlu0 %339 }
 0x1ce   :  { %v341_v29 = vmul.f32 0.001953125, %v340_v28 }
 0x1d0   :  { %v342_v30 = vsub.f32 %v261_v20, %v341_v29  ;;  %v343_v31 = vsub.f32 %v263_v21, %v341_v29  ;;  %v344_v32 = vsub.f32 %v332_v23, %v341_v29  ;;  %v345_v33 = vsub.f32 %v334_v25, %v341_v29 }
 0x1d1   :  { %v568_v10 = vpop.permute.xlu0 %567  ;;  %v445_v21 = vand.u32 255, %v389_v18  ;;  %v404_v29 = vand.u32 15, %v2418_v22 }
 0x1d2   :  { %v346_v34 = vmul.f32 %v342_v30, %v342_v30  ;;  %v347_v35 = vmul.f32 %v343_v31, %v343_v31  ;;  %v348_v36 = vmul.f32 %v344_v32, %v344_v32  ;;  %v349_v38 = vmul.f32 %v345_v33, %v345_v33 }
 0x1d3   :  { %vm2422_vm3 = vcmp.ge.s32.totalorder %v445_v21, 16  ;;  %vm2438_vm7 = vcmp.ge.s32.totalorder %v404_v29, 1  ;;  %vm2493_vm15 = vcmp.le.s32.totalorder %v404_v29, 14 }
 0x1d4   :  { %v350_v37 = vadd.f32 %v347_v35, %v346_v34  ;;  %vm510_vm8 = vmand %vm2422_vm3, %vm2433_vm5 }
 0x1d5   :  { %v2408_v12 = vpop.permute.xlu0 %714  ;;  %vm860_vm0 = vmand %vm2422_vm3, %vm2487_vm13 }
 0x1d6   :  { %v351_v39 = vadd.f32 %v350_v37, %v348_v36  ;;  %v391_v36 = vadd.s32 256, %v389_v18 }
 0x1d8   :  { %v352_v40 = vadd.f32 %v351_v39, %v349_v38  ;;  %v2453_v39 = vadd.s32 384, %v389_v18 }
 0x1d9   :  { %v2412_v14 = vpop.permute.xlu0 %887 }
 0x1da   :  { %353 = vadd.xlane.f32.xlu1 %v352_v40 }
 0x1dd   :  { %v2416_v17 = vpop.permute.xlu0 %1060 }
 0x1eb   :  { %1037 = vrot.lane.b32.xlu1 %v2217_v3, %s2225_s24 }
 0x1ef   :  { %1210 = vrot.lane.b32.xlu1 %v2262_v0, %s2227_s26 }
 0x1f3   :  { %1393 = vrot.lane.b32.xlu1 %v2262_v0, %s2229_s28 }
 0x1f7   :  { %1378 = vrot.lane.b32.xlu1 %v2217_v3, %s2231_s30 }
 0x1fb   :  { %1570 = vrot.lane.b32.xlu1 %v2262_v0, %s2232_s4 }
 0x1ff   :  { %1555 = vrot.lane.b32.xlu1 %v2217_v3, %s2233_s5 }
 0x203   :  { %1743 = vrot.lane.b32.xlu1 %v2262_v0, %s2234_s6 }
 0x207   :  { %1728 = vrot.lane.b32.xlu1 %v2217_v3, %s2224_s23 }
 0x20b   :  { %1920 = vrot.lane.b32.xlu1 %v2262_v0, %s2235_s7 }
 0x263   :  { %v354_v46 = vpop.xlane.xlu1 %353 }
 0x264   :  { %v355_v47 = vmul.f32 0.001953125, %v354_v46  ;;  %v418_v46 = vand.u32 15, %v2453_v39 }
 0x266   :  { %v356_v48 = vadd.f32 1e-05, %v355_v47  ;;  %vm2475_vm11 = vcmp.ge.s32.totalorder %v418_v46, 1 }
 0x267   :  { %v2393_v4 = vpop.permute.xlu1 %1037 }
 0x268   :  { %2213 = vrsqrt.f32 %v356_v48 }
 0x26b   :  { %v2396_v5 = vpop.permute.xlu1 %1210 }
 0x26f   :  { %v2398_v6 = vpop.permute.xlu1 %1393 }
 0x273   :  { %v2400_v7 = vpop.permute.xlu1 %1378 }
 0x275   :  { %v2214_v49 = vpop.eup %2213 }
 0x276   :  { %v361_v50 = vmul.f32 %v2214_v49, %v345_v33  ;;  %v358_v51 = vmul.f32 %v2214_v49, %v342_v30  ;;  %v359_v52 = vmul.f32 %v2214_v49, %v343_v31  ;;  %v360_v62 = vmul.f32 %v2214_v49, %v344_v32 }
 0x277   :  { %v2402_v8 = vpop.permute.xlu1 %1570 }
 0x278   :  { %v369_v53 = vmul.f32 %v364_v41, %v361_v50  ;;  %v366_v54 = vmul.f32 %v364_v41, %v358_v51  ;;  %v367_v55 = vmul.f32 %v364_v41, %v359_v52  ;;  %v368_v63 = vmul.f32 %v364_v41, %v360_v62 }
 0x27a   :  { %v377_v56 = vadd.f32 %v372_v42, %v369_v53  ;;  %v374_v57 = vadd.f32 %v372_v42, %v366_v54  ;;  %v375_v60 = vadd.f32 %v372_v42, %v367_v55  ;;  %v376_v1 = vadd.f32 %v372_v42, %v368_v63 }
 0x27b   :  { %v2404_v9 = vpop.permute.xlu1 %1555  ;;  %v459_v42 = vand.u32 255, %v391_v36 }
 0x27c   :  { %v2325_v58 = vmax.f32 %v377_v56, 0.0  ;;  %v2327_v59 = vmax.f32 %v374_v57, 0.0  ;;  %v2333_v61 = vmax.f32 %v375_v60, 0.0  ;;  %v2347_v2 = vmax.f32 %v376_v1, 0.0 }
 0x27d   :  { %vm2463_vm9 = vcmp.ge.s32.totalorder %v459_v42, 16 }
 0x27e   :  { %527 = vrot.lane.b32.xlu0 %v2325_v58, %s2222_s1  ;;  %545 = vrot.lane.b32.xlu1 %v2327_v59, %s2221_s0 }
 0x27f   :  { %v2406_v11 = vpop.permute.xlu1 %1743 }
 0x282   :  { %868 = vrot.lane.b32.xlu0 %v2333_v61, %s2223_s22  ;;  %547 = vrot.lane.b32.xlu1 %v2333_v61, %s2221_s0 }
 0x283   :  { %v2410_v13 = vpop.permute.xlu1 %1728 }
 0x286   :  { %872 = vrot.lane.b32.xlu0 %v2325_v58, %s2223_s22  ;;  %521 = vrot.lane.b32.xlu1 %v2327_v59, %s2222_s1 }
 0x287   :  { %v2414_v16 = vpop.permute.xlu1 %1920 }
 0x28a   :  { %1041 = vrot.lane.b32.xlu0 %v2333_v61, %s2225_s24  ;;  %523 = vrot.lane.b32.xlu1 %v2333_v61, %s2222_s1 }
 0x28e   :  { %1045 = vrot.lane.b32.xlu0 %v2325_v58, %s2225_s24  ;;  %549 = vrot.lane.b32.xlu1 %v2347_v2, %s2221_s0 }
 0x292   :  { %1372 = vrot.lane.b32.xlu0 %v2333_v61, %s2231_s30  ;;  %551 = vrot.lane.b32.xlu1 %v2325_v58, %s2221_s0 }
 0x296   :  { %1370 = vrot.lane.b32.xlu0 %v2327_v59, %s2231_s30  ;;  %525 = vrot.lane.b32.xlu1 %v2347_v2, %s2222_s1 }
 0x29a   :  { %1376 = vrot.lane.b32.xlu0 %v2325_v58, %s2231_s30  ;;  %866 = vrot.lane.b32.xlu1 %v2327_v59, %s2223_s22 }
 0x29e   :  { %1549 = vrot.lane.b32.xlu0 %v2333_v61, %s2233_s5  ;;  %870 = vrot.lane.b32.xlu1 %v2347_v2, %s2223_s22 }
 0x2a2   :  { %1547 = vrot.lane.b32.xlu0 %v2327_v59, %s2233_s5  ;;  %1039 = vrot.lane.b32.xlu1 %v2327_v59, %s2225_s24 }
 0x2a6   :  { %1553 = vrot.lane.b32.xlu0 %v2325_v58, %s2233_s5  ;;  %1043 = vrot.lane.b32.xlu1 %v2347_v2, %s2225_s24 }
 0x2aa   :  { %1722 = vrot.lane.b32.xlu0 %v2333_v61, %s2224_s23  ;;  %1374 = vrot.lane.b32.xlu1 %v2347_v2, %s2231_s30 }
 0x2ae   :  { %1720 = vrot.lane.b32.xlu0 %v2327_v59, %s2224_s23  ;;  %1551 = vrot.lane.b32.xlu1 %v2347_v2, %s2233_s5 }
 0x2b2   :  { %1726 = vrot.lane.b32.xlu0 %v2325_v58, %s2224_s23  ;;  %1724 = vrot.lane.b32.xlu1 %v2347_v2, %s2224_s23 }
 0x2b6   :  { %1899 = vrot.lane.b32.xlu0 %v2333_v61, %s2236_s8  ;;  %1901 = vrot.lane.b32.xlu1 %v2347_v2, %s2236_s8 }
 0x2ba   :  { %1897 = vrot.lane.b32.xlu0 %v2327_v59, %s2236_s8  ;;  %1905 = vrot.lane.b32.xlu1 %v2217_v3, %s2236_s8 }
 0x2be   :  { %1903 = vrot.lane.b32.xlu0 %v2325_v58, %s2236_s8 }
 0x2f0   :  { %v546_v19 = vpop.permute.xlu1 %545  ;;  %v528_v20 = vpop.permute.xlu0 %527 }
 0x2f1   :  { %v554_v28 = vsel %vm553_vm2, %v2319_v43, %v546_v19  ;;  %v411_v43 = vand.u32 15, %v391_v36 }
 0x2f3   :  { %vm2468_vm10 = vcmp.ge.s32.totalorder %v411_v43, 1  ;;  %vm2507_vm1 = vcmp.le.s32.totalorder %v411_v43, 14 }
 0x2f4   :  { %v548_v23 = vpop.permute.xlu1 %547  ;;  %v2420_v24 = vpop.permute.xlu0 %868  ;;  %vm512_vm12 = vmand %vm2463_vm9, %vm2468_vm10 }
 0x2f5   :  { %v555_v26 = vsel %vm553_vm2, %v546_v19, %v548_v23 }
 0x2f6   :  { %602 = vmatprep.subr.mxu0 %v555_v26  ;;  %v466_v26 = vand.u32 255, %v2453_v39 }
 0x2f7   :  { %2136 = vmatpush1.msk.msra.mxu0 %vm2422_vm3, %v554_v28  ;;  %vm862_vm3 = vmand %vm2463_vm9, %vm2507_vm1 }
 0x2f8   :  { %v522_v30 = vpop.permute.xlu1 %521  ;;  %2137 = vmatmul.mubr.msk.f32.vlgmr.msra.gmra.mxu0 %vm569_vm4, %v568_v10  ;;  %v873_v31 = vpop.permute.xlu0 %872 }
 0x2f9   :  { %782 = vmatprep.mubr.f32.mxu0 %v2217_v3  ;;  %v530_v38 = vsel %vm529_vm6, %v2321_v44, %v522_v30 }
 0x2fc   :  { %v524_v34 = vpop.permute.xlu1 %523  ;;  %v2442_v35 = vpop.permute.xlu0 %1041 }
 0x2fd   :  { %v531_v37 = vsel %vm529_vm6, %v522_v30, %v524_v34 }
 0x2fe   :  { %2140 = vmatprep.subr.msk.mxu0 %vm2438_vm7, %v531_v37 }
 0x2ff   :  { %2141 = vmatpush1.msk.msra.mxu0 %vm510_vm8, %v530_v38  ;;  %vm1380_vm8 = vcmask 1039360  }
 0x300   :  { %v550_v40 = vpop.permute.xlu1 %549  ;;  %2142 = vmatmul.mubr.msk.f32.vlgmr.msra.gmra.mxu0 %vm569_vm4, %v2408_v12  ;;  %v2457_v41 = vpop.permute.xlu0 %1045 }
 0x301   :  { %955 = vmatprep.mubr.f32.mxu0 %v2217_v3  ;;  %v556_v51 = vsel %vm553_vm2, %v548_v23, %v550_v40 }
 0x304   :  { %v552_v47 = vpop.permute.xlu1 %551  ;;  %v2461_v44 = vpop.permute.xlu0 %1372 }
 0x305   :  { %v557_v49 = vsel %vm553_vm2, %v550_v40, %v552_v47  ;;  %vm2514_vm2 = vcmp.le.s32.totalorder %v418_v46, 14 }
 0x306   :  { %673 = vmatprep.subr.mxu1 %v557_v49 }
 0x307   :  { %2138 = vmatpush1.msk.msra.mxu1 %vm2463_vm9, %v556_v51  ;;  %vm2556_vm9 = vcmp.lt.s32.totalorder %v466_v26, 240 }
 0x308   :  { %v526_v53 = vpop.permute.xlu1 %525  ;;  %2139 = vmatmul.mubr.msk.f32.vlgmr.msra.gmra.mxu1 %vm569_vm4, %v568_v10  ;;  %v1371_v54 = vpop.permute.xlu0 %1370 }
 0x309   :  { %v532_v55 = vsel %vm529_vm6, %v524_v34, %v526_v53  ;;  %v533_v56 = vsel %vm529_vm6, %v526_v53, %v528_v20  ;;  %853 = vmatprep.mubr.f32.mxu1 %v2217_v3  ;;  %vm1047_vm6 = vcmask 7168   ;;  %v1381_v34 = vsel %vm1380_vm8, %v1371_v54, %v2461_v44 }
 0x30a   :  { %2143 = vmatprep.subr.msk.mxu1 %vm2475_vm11, %v533_v56 }
 0x30b   :  { %2144 = vmatpush1.msk.msra.mxu1 %vm512_vm12, %v532_v55 }
 0x30c   :  { %v867_v62 = vpop.permute.xlu1 %866  ;;  %2145 = vmatmul.mubr.msk.f32.vlgmr.msra.gmra.mxu1 %vm569_vm4, %v2408_v12  ;;  %v1377_v63 = vpop.permute.xlu0 %1376 }
 0x30d   :  { %v875_v1 = vsel %vm874_vm14, %v2323_v45, %v867_v62  ;;  %v876_v10 = vsel %vm874_vm14, %v867_v62, %v2420_v24  ;;  %1026 = vmatprep.mubr.f32.mxu1 %v2217_v3 }
 0x30e   :  { %2146 = vmatprep.subr.msk.mxu0 %vm2493_vm15, %v876_v10 }
 0x30f   :  { %2147 = vmatpush1.msk.msra.mxu0 %vm860_vm0, %v875_v1  ;;  %vm1557_vm0 = vcmask 924672  }
 0x310   :  { %v871_v18 = vpop.permute.xlu1 %870  ;;  %2148 = vmatmul.mubr.msk.f32.vlgmr.msra.gmra.mxu0 %vm569_vm4, %v2412_v14  ;;  %v1550_v45 = vpop.permute.xlu0 %1549 }
 0x311   :  { %v877_v19 = vsel %vm874_vm14, %v2420_v24, %v871_v18  ;;  %v878_v20 = vsel %vm874_vm14, %v871_v18, %v873_v31  ;;  %1128 = vmatprep.mubr.f32.mxu0 %v2217_v3  ;;  %vm1546_vm14 = vmand %vm2556_vm9, %vm2475_vm11 }
 0x312   :  { %2149 = vmatprep.subr.msk.mxu1 %vm2514_vm2, %v878_v20 }
 0x313   :  { %2150 = vmatpush1.msk.msra.mxu1 %vm862_vm3, %v877_v19 }
 0x314   :  { %v1040_v21 = vpop.permute.xlu1 %1039  ;;  %2151 = vmatmul.mubr.msk.f32.vlgmr.msra.gmra.mxu1 %vm569_vm4, %v2412_v14  ;;  %v1548_v23 = vpop.permute.xlu0 %1547  ;;  %v452_v14 = vand.u32 255, %v2418_v22 }
 0x315   :  { %v1048_v25 = vsel %vm1047_vm6, %v2393_v4, %v1040_v21  ;;  %v1049_v24 = vsel %vm1047_vm6, %v1040_v21, %v2442_v35  ;;  %1199 = vmatprep.mubr.f32.mxu1 %v2217_v3  ;;  %v1558_v33 = vsel %vm1557_vm0, %v1548_v23, %v1550_v45 }
 0x316   :  { %2152 = vmatprep.subr.msk.mxu0 %vm2438_vm7, %v1049_v24  ;;  %vm2564_vm12 = vcmp.lt.s32.totalorder %v452_v14, 240 }
 0x317   :  { %2153 = vmatpush1.msk.msra.mxu0 %vm2433_vm5, %v1048_v25  ;;  %vm1544_vm3 = vmand %vm2564_vm12, %vm2438_vm7  ;;  %vm1730_vm7 = vcmask 916480  }
 0x318   :  { %v1044_v27 = vpop.permute.xlu1 %1043  ;;  %2154 = vmatmul.mubr.msk.f32.vlgmr.msra.gmra.mxu0 %vm569_vm4, %v2416_v17  ;;  %1244 = vmatprep.subr.mxu0 %v2333_v61  ;;  %v1554_v4 = vpop.permute.xlu0 %1553 }
 0x319   :  { %v1050_v28 = vsel %vm1047_vm6, %v2442_v35, %v1044_v27  ;;  %v1051_v29 = vsel %vm1047_vm6, %v1044_v27, %v2457_v41  ;;  %1245 = vmatpush1.msra.mxu0 %v2327_v59  ;;  %1278 = vmatprep.mubr.f32.mxu0 %v2217_v3  ;;  %v1561_v35 = vsel %vm1557_vm0, %v1554_v4, %v2404_v9 }
 0x31a   :  { %2155 = vmatprep.subr.msk.mxu1 %vm2475_vm11, %v1051_v29  ;;  %vm1896_vm11 = vmand %vm2556_vm9, %vm2514_vm2 }
 0x31b   :  { %2156 = vmatpush1.msk.msra.mxu1 %vm2468_vm10, %v1050_v28 }
 0x31c   :  { %v1375_v22 = vpop.permute.xlu1 %1374  ;;  %2157 = vmatmul.mubr.msk.f32.vlgmr.msra.gmra.mxu1 %vm569_vm4, %v2416_v17  ;;  %2158 = vmatmul.mubr.msk.f32.vlgmr.msra.gmra.mxu0 %vm569_vm4, %v2396_v5  ;;  %v1723_v59 = vpop.permute.xlu0 %1722  ;;  %v1384_v17 = vsel %vm1380_vm8, %v1377_v63, %v2400_v7 }
 0x31d   :  { %v1382_v31 = vsel %vm1380_vm8, %v2461_v44, %v1375_v22  ;;  %1315 = vmatprep.subr.mxu1 %v2325_v58  ;;  %1349 = vmatprep.mubr.f32.mxu1 %v2217_v3  ;;  %v1383_v58 = vsel %vm1380_vm8, %v1375_v22, %v1377_v63 }
 0x31e   :  { %1316 = vmatpush1.msra.mxu1 %v2347_v2  ;;  %2160 = vmatprep.subr.msk.mxu0 %vm2493_vm15, %v1382_v31 }
 0x31f   :  { %2163 = vmatprep.subr.msk.mxu1 %vm2514_vm2, %v1384_v17  ;;  %2161 = vmatpush1.msk.msra.mxu0 %vm2487_vm13, %v1381_v34 }
 0x320   :  { %1461 = vmatprep.mubr.f32.mxu0 %v2217_v3  ;;  %v1552_v2 = vpop.permute.xlu1 %1551  ;;  %2159 = vmatmul.mubr.msk.f32.vlgmr.msra.gmra.mxu1 %vm569_vm4, %v2396_v5  ;;  %v1721_v7 = vpop.permute.xlu0 %1720 }
 0x321   :  { %v1559_v36 = vsel %vm1557_vm0, %v1550_v45, %v1552_v2  ;;  %2162 = vmatmul.mubr.msk.f32.vlgmr.msra.gmra.mxu0 %vm569_vm4, %v2398_v6  ;;  %2164 = vmatpush1.msk.msra.mxu1 %vm2507_vm1, %v1383_v58  ;;  %v1560_v5 = vsel %vm1557_vm0, %v1552_v2, %v1554_v4  ;;  %v1731_v39 = vsel %vm1730_vm7, %v1721_v7, %v1723_v59 }
 0x322   :  { %2169 = vmatprep.subr.msk.mxu1 %vm1546_vm14, %v1561_v35  ;;  %2166 = vmatprep.subr.msk.mxu0 %vm1544_vm3, %v1559_v36 }
 0x323   :  { %1532 = vmatprep.mubr.f32.mxu1 %v2217_v3  ;;  %2167 = vmatpush1.msk.msra.mxu0 %vm2433_vm5, %v1558_v33  ;;  %vm1907_vm5 = vcmask 908288  }
 0x324   :  { %1638 = vmatprep.mubr.f32.mxu0 %v2217_v3  ;;  %v1725_v9 = vpop.permute.xlu1 %1724  ;;  %2165 = vmatmul.mubr.msk.f32.vlgmr.msra.gmra.mxu1 %vm569_vm4, %v2398_v6  ;;  %v1727_v37 = vpop.permute.xlu0 %1726 }
 0x325   :  { %v1732_v38 = vsel %vm1730_vm7, %v1723_v59, %v1725_v9  ;;  %2168 = vmatmul.mubr.msk.f32.vlgmr.msra.gmra.mxu0 %vm569_vm4, %v2402_v8  ;;  %2170 = vmatpush1.msk.msra.mxu1 %vm2468_vm10, %v1560_v5  ;;  %v1734_v32 = vsel %vm1730_vm7, %v1727_v37, %v2410_v13  ;;  %vm1894_vm10 = vmand %vm2564_vm12, %vm2493_vm15  ;;  %v1733_v6 = vsel %vm1730_vm7, %v1725_v9, %v1727_v37 }
 0x326   :  { %2172 = vmatprep.subr.msk.mxu0 %vm2564_vm12, %v1732_v38  ;;  %2174 = vmatprep.subr.msk.mxu1 %vm2556_vm9, %v1734_v32 }
 0x327   :  { %1709 = vmatprep.mubr.f32.mxu1 %v2217_v3  ;;  %1778 = vmatpush1.msra.mxu0 %v1731_v39 }
 0x328   :  { %1811 = vmatprep.mubr.f32.mxu0 %v2217_v3  ;;  %v1902_v13 = vpop.permute.xlu1 %1901  ;;  %2171 = vmatmul.mubr.msk.f32.vlgmr.msra.gmra.mxu1 %vm569_vm4, %v2402_v8  ;;  %v1900_v40 = vpop.permute.xlu0 %1899 }
 0x329   :  { %2173 = vmatmul.mubr.msk.f32.vlgmr.msra.gmra.mxu0 %vm569_vm4, %v2406_v11  ;;  %1849 = vmatpush1.msra.mxu1 %v1733_v6  ;;  %v1909_v41 = vsel %vm1907_vm5, %v1900_v40, %v1902_v13 }
 0x32a   :  { %2176 = vmatprep.subr.msk.mxu0 %vm1894_vm10, %v1909_v41  ;;  %1882 = vmatprep.mubr.f32.mxu1 %v2217_v3 }
 0x32b   :  { %1988 = vmatprep.mubr.f32.mxu0 %v2217_v3 }
 0x32c   :  { %2175 = vmatmul.mubr.msk.f32.vlgmr.msra.gmra.mxu1 %vm569_vm4, %v2406_v11  ;;  %v1898_v42 = vpop.permute.xlu0 %1897  ;;  %v1906_v8 = vpop.permute.xlu1 %1905 }
 0x32d   :  { %v1908_v43 = vsel %vm1907_vm5, %v1898_v42, %v1900_v40  ;;  %2059 = vmatprep.mubr.f32.mxu1 %v2217_v3 }
 0x32e   :  { %2177 = vmatpush1.msk.msra.mxu0 %vm2487_vm13, %v1908_v43 }
 0x32f   :  { %2178 = vmatmul.mubr.msk.f32.vlgmr.msra.gmra.mxu0 %vm569_vm4, %v2414_v16 }
 0x330   :  { %v1904_v46 = vpop.permute.xlu0 %1903 }
 0x331   :  { %v1910_v11 = vsel %vm1907_vm5, %v1902_v13, %v1904_v46  ;;  %v1911_v47 = vsel %vm1907_vm5, %v1904_v46, %v1906_v8 }
 0x332   :  { %2179 = vmatprep.subr.msk.mxu1 %vm1896_vm11, %v1911_v47 }
 0x333   :  { %2180 = vmatpush1.msk.msra.mxu1 %vm2507_vm1, %v1910_v11 }
 0x334   :  { %2181 = vmatmul.mubr.msk.f32.vlgmr.msra.gmra.mxu1 %vm569_vm4, %v2414_v16 }
 0x3b8   :  { %v638_v3 = vpop.f32.mrf.mxu0 }
 0x3ba   :  { %v640_v48 = vpop.f32.mrf.mxu0 }
 0x3c0   :  { %v784_v49 = vpop.f32.mrf.mxu0 }
 0x3c1   :  { %v785_v19 = vadd.f32 %v784_v49, %v638_v3 }
 0x3c2   :  { %v786_v51 = vpop.f32.mrf.mxu0 }
 0x3c3   :  { %v787_v20 = vadd.f32 %v786_v51, %v640_v48 }
 0x3c8   :  { %v709_v44 = vpop.f32.mrf.mxu1 }
 0x3ca   :  { %v711_v50 = vpop.f32.mrf.mxu1 }
 0x3cc   :  { %v855_v52 = vpop.f32.mrf.mxu1 }
 0x3cd   :  { %v856_v27 = vadd.f32 %v855_v52, %v709_v44 }
 0x3ce   :  { %v857_v54 = vpop.f32.mrf.mxu1 }
 0x3cf   :  { %v858_v61 = vadd.f32 %v857_v54, %v711_v50  ;;  %v2237_v54 = vmov 82  }
 0x3d0   :  { %v957_v53 = vpop.f32.mrf.mxu0  ;;  %2206 = vset.pattern.permute.xlu0 %v2237_v54 }
 0x3d1   :  { %v1033_v25 = vadd.f32 %v957_v53, %v785_v19 }
 0x3d2   :  { %v959_v55 = vpop.f32.mrf.mxu0 }
 0x3d3   :  { %v1034_v24 = vadd.f32 %v959_v55, %v787_v20  ;;  %v2238_v55 = vmov 83  }
 0x3d4   :  { %v1028_v56 = vpop.f32.mrf.mxu1  ;;  %2207 = vset.pattern.permute.xlu1 %v2238_v55 }
 0x3d5   :  { %v1035_v22 = vadd.f32 %v1028_v56, %v856_v27 }
 0x3d6   :  { %v1030_v60 = vpop.f32.mrf.mxu1 }
 0x3d7   :  { %v1036_v17 = vadd.f32 %v1030_v60, %v858_v61 }
 0x3d8   :  { %v1130_v57 = vpop.f32.mrf.mxu0 }
 0x3d9   :  { %v1206_v14 = vadd.f32 %v1130_v57, %v1033_v25 }
 0x3da   :  { %v1132_v62 = vpop.f32.mrf.mxu0 }
 0x3db   :  { %v1207_v28 = vadd.f32 %v1132_v62, %v1034_v24 }
 0x3dc   :  { %v1201_v63 = vpop.f32.mrf.mxu1  ;;  %v1280_v1 = vpop.f32.mrf.mxu0 }
 0x3dd   :  { %v1356_v30 = vadd.f32 %v1280_v1, %v1206_v14  ;;  %v1208_v58 = vadd.f32 %v1201_v63, %v1035_v22 }
 0x3de   :  { %v1203_v10 = vpop.f32.mrf.mxu1  ;;  %v1282_v15 = vpop.f32.mrf.mxu0 }
 0x3df   :  { %v1357_v31 = vadd.f32 %v1282_v15, %v1207_v28  ;;  %v1209_v35 = vadd.f32 %v1203_v10, %v1036_v17 }
 0x3e0   :  { %v1351_v12 = vpop.f32.mrf.mxu1 }
 0x3e1   :  { %v1463_v16 = vpop.f32.mrf.mxu0  ;;  %v1358_v36 = vadd.f32 %v1351_v12, %v1208_v58 }
 0x3e2   :  { %v1353_v18 = vpop.f32.mrf.mxu1  ;;  %v1539_v2 = vadd.f32 %v1463_v16, %v1356_v30 }
 0x3e3   :  { %v1465_v45 = vpop.f32.mrf.mxu0  ;;  %v1359_v38 = vadd.f32 %v1353_v18, %v1209_v35 }
 0x3e4   :  { %v1534_v21 = vpop.f32.mrf.mxu1  ;;  %v1540_v7 = vadd.f32 %v1465_v45, %v1357_v31 }
 0x3e5   :  { %v1640_v23 = vpop.f32.mrf.mxu0  ;;  %v1541_v32 = vadd.f32 %v1534_v21, %v1358_v36 }
 0x3e6   :  { %v1536_v26 = vpop.f32.mrf.mxu1  ;;  %v1716_v5 = vadd.f32 %v1640_v23, %v1539_v2 }
 0x3e7   :  { %v1642_v4 = vpop.f32.mrf.mxu0  ;;  %v1542_v40 = vadd.f32 %v1536_v26, %v1359_v38 }
 0x3e8   :  { %v1711_v29 = vpop.f32.mrf.mxu1  ;;  %v1717_v9 = vadd.f32 %v1642_v4, %v1540_v7 }
 0x3e9   :  { %v1813_v59 = vpop.f32.mrf.mxu0  ;;  %v1718_v41 = vadd.f32 %v1711_v29, %v1541_v32 }
 0x3ea   :  { %v1713_v34 = vpop.f32.mrf.mxu1  ;;  %v1889_v6 = vadd.f32 %v1813_v59, %v1716_v5 }
 0x3eb   :  { %v1815_v33 = vpop.f32.mrf.mxu0  ;;  %v1719_v11 = vadd.f32 %v1713_v34, %v1542_v40 }
 0x3ec   :  { %v1884_v37 = vpop.f32.mrf.mxu1  ;;  %v1890_v13 = vadd.f32 %v1815_v33, %v1717_v9 }
 0x3ed   :  { %v1891_v47 = vadd.f32 %v1884_v37, %v1718_v41 }
 0x3ee   :  { %v1886_v43 = vpop.f32.mrf.mxu1 }
 0x3ef   :  { %v1990_v39 = vpop.f32.mrf.mxu0  ;;  %v1892_v48 = vadd.f32 %v1886_v43, %v1719_v11 }
 0x3f0   :  { %v2066_v8 = vadd.f32 %v1990_v39, %v1889_v6 }
 0x3f1   :  { %v1992_v42 = vpop.f32.mrf.mxu0 }
 0x3f2   :  { %v2067_v46 = vadd.f32 %v1992_v42, %v1890_v13 }
 0x3f4   :  { %v2070_v3 = vadd.f32 %v2067_v46, %v2066_v8  ;;  %v2061_v44 = vpop.f32.mrf.mxu1 }
 0x3f5   :  { %v2068_v49 = vadd.f32 %v2061_v44, %v1891_v47 }
 0x3f6   :  { %v2063_v50 = vpop.f32.mrf.mxu1 }
 0x3f7   :  { %v2071_v51 = vadd.f32 %v2070_v3, %v2068_v49  ;;  %v2069_v52 = vadd.f32 %v2063_v50, %v1892_v48 }
 0x3f9   :  { %v2072_v53 = vadd.f32 %v2071_v51, %v2069_v52 }
 0x3fb   :  { %2073 = vadd.xlane.f32.xlu0 %v2072_v53 }
 0x411   :  { %2097 = vperm.xlu0 %2206, %v2262_v0  }
 0x415   :  { %2208 = vset.pattern.permute.xlu0 %v2238_v55 }
 0x484   :  { %v2074_v56 = vpop.xlane.xlu0 %2073 }
 0x485   :  { %v2075_v57 = vmul.f32 0.001953125, %v2074_v56 }
 0x487   :  { %v2076_v60 = vsub.f32 %v2066_v8, %v2075_v57  ;;  %v2077_v62 = vsub.f32 %v2067_v46, %v2075_v57  ;;  %v2078_v63 = vsub.f32 %v2068_v49, %v2075_v57  ;;  %v2079_v1 = vsub.f32 %v2069_v52, %v2075_v57 }
 0x489   :  { %v2080_v10 = vmul.f32 %v2076_v60, %v2076_v60  ;;  %v2081_v15 = vmul.f32 %v2077_v62, %v2077_v62  ;;  %v2082_v12 = vmul.f32 %v2078_v63, %v2078_v63  ;;  %v2083_v18 = vmul.f32 %v2079_v1, %v2079_v1 }
 0x48b   :  { %v2084_v16 = vadd.f32 %v2081_v15, %v2080_v10 }
 0x48c   :  { %v2098_v24 = vpop.permute.xlu0 %2097 }
 0x48d   :  { %v2085_v45 = vadd.f32 %v2084_v16, %v2082_v12 }
 0x48f   :  { %v2086_v19 = vadd.f32 %v2085_v45, %v2083_v18 }
 0x491   :  { %2087 = vadd.xlane.f32.xlu1 %v2086_v19 }
 0x4a2   :  { %2105 = vperm.xlu1 %2207, %v2262_v0  }
 0x51a   :  { %v2088_v20 = vpop.xlane.xlu1 %2087 }
 0x51b   :  { %v2089_v21 = vmul.f32 0.001953125, %v2088_v20 }
 0x51d   :  { %v2090_v23 = vadd.f32 1e-05, %v2089_v21 }
 0x51e   :  { %v2106_v28 = vpop.permute.xlu1 %2105 }
 0x51f   :  { %2215 = vrsqrt.f32 %v2090_v23 }
 0x52c   :  { %v2216_v25 = vpop.eup %2215 }
 0x52d   :  { %v2092_v26 = vmul.f32 %v2216_v25, %v2076_v60  ;;  %v2093_v27 = vmul.f32 %v2216_v25, %v2077_v62  ;;  %v2094_v4 = vmul.f32 %v2216_v25, %v2078_v63  ;;  %v2095_v14 = vmul.f32 %v2216_v25, %v2079_v1 }
 0x52f   :  { %v2100_v29 = vmul.f32 %v2098_v24, %v2092_v26  ;;  %v2101_v61 = vmul.f32 %v2098_v24, %v2093_v27  ;;  %v2102_v22 = vmul.f32 %v2098_v24, %v2094_v4  ;;  %v2103_v59 = vmul.f32 %v2098_v24, %v2095_v14 }
 0x531   :  { %v2108_v30 = vadd.f32 %v2106_v28, %v2100_v29  ;;  %v2109_v31 = vadd.f32 %v2106_v28, %v2101_v61  ;;  %v2110_v34 = vadd.f32 %v2106_v28, %v2102_v22  ;;  %v2111_v17 = vadd.f32 %v2106_v28, %v2103_v59 }
 0x533   :  { %v2112_v0 = vmax.f32 %v2108_v30, 0.0  ;;  %v2113_v58 = vmax.f32 %v2109_v31, 0.0  ;;  %v2114_v2 = vmax.f32 %v2110_v34, 0.0  ;;  %v2115_v7 = vmax.f32 %v2111_v17, 0.0 }
 0x535   :  { %2116 = vst [vmem:[%s2671_s3] sm:$0xff] %v2112_v0  ;;  %2117 = vst [vmem:[%s2671_s3 + $0x8] sm:$0xff] %v2113_v58 }
 0x536   :  { %2118 = vst [vmem:[%s2671_s3 + $0x10] sm:$0xff] %v2114_v2  ;;  %2119 = vst [vmem:[%s2671_s3 + $0x18] sm:$0xff] %v2115_v7 }

</bundles_post_ra>
